<compile_context>
chip_gen: v7x
topology: tpu7x:2x2x1
jax: 0.10.0
libtpu: 0.0.40
codegen_flags: <defaults>
</compile_context>

<pallas_src>
import functools

import jax
import jax.numpy as jnp
from jax.experimental import pallas as pl
from jax.experimental.pallas import tpu as pltpu


def _cdiv(a, b):
    return -(-a // b)


def _round_up(x, m):
    return _cdiv(x, m) * m


def _vmem_budget_bytes():
    cap = 64 * 1024 * 1024  # conservative fallback (v7x per-core VMEM)
    try:
        info = pltpu.get_tpu_info()
        cap = int(getattr(info, "vmem_capacity_bytes", cap) or cap)
    except Exception:
        pass
    # 20% headroom for compiler-internal scratch / semaphores / DMA state;
    # never request more than ~100 MiB even on 128-MiB parts (v5e / v6e).
    return int(min(0.80 * cap, 100 * 1024 * 1024))


def _choose_tiles(M, kdim, n_pad, in_isz, out_isz, sub, budget, tm, tn, tk):
    """Pick (tm, tn, tk) preferring a fully resident weight block."""

    def fits(tm_, tn_, tk_):
        need = (
            2 * tm_ * tk_ * in_isz        # activation blocks (double-buffered)
            + 2 * tk_ * tn_ * in_isz      # weight blocks
            + 2 * tn_ * 4                 # bias (f32)
            + 2 * tm_ * 4                 # row mask (int32)
            + 2 * tm_ * tn_ * out_isz     # output blocks
            + (tm_ * tn_ * 4 if tk_ < kdim else 0)  # f32 accumulator scratch
        )
        return need <= budget

    m_cap = _round_up(M, sub)
    if tm is not None:
        tm_cands = [max(sub, min(_round_up(tm, sub), m_cap))]
    else:
        tm_cands = []
        for t in (1024, 512, 256, 128, 64, 32, 16, 8):
            if t % sub:
                continue
            t = min(t, m_cap)
            if t not in tm_cands:
                tm_cands.append(t)
        if not tm_cands:
            tm_cands = [m_cap]

    if tn is not None:
        tn_cands = [min(_round_up(tn, 128), n_pad)]
    else:
        tn_cands = [n_pad] + [t for t in (1024, 512, 256, 128) if t < n_pad]

    if tk is not None:
        tk_cands = [kdim if tk >= kdim else _round_up(tk, 128)]
    else:
        tk_cands = [kdim] + [t for t in (2048, 1024, 512, 256, 128) if t < kdim]

    # Pass 1: insist on MXU-friendly row tiles (>=256 rows) unless the problem
    # itself is smaller; pass 2: relax to the sublane minimum.
    for tm_floor in (min(256, m_cap), sub):
        for tn_ in tn_cands:
            for tk_ in tk_cands:
                for tm_ in tm_cands:
                    if tm_ < tm_floor:
                        continue
                    if fits(tm_, tn_, tk_):
                        return tm_, tn_, tk_
    return sub, min(128, n_pad), min(128, kdim)


# ---------------------------------------------------------------------------
# Kernels
# ---------------------------------------------------------------------------
def _decoder_kernel_2d(tile_valid_ref, fetch_ref, x_ref, w_ref, b_ref, mask_ref,
                       o_ref, *, m_axis):
    # tile_valid_ref / fetch_ref: SMEM int32[num_m] (scalar prefetch);
    # fetch_ref is only consumed by the x index_map.
    del fetch_ref
    i = pl.program_id(m_axis)
    valid = tile_valid_ref[i] != 0

    @pl.when(valid)
    def _compute():
        y = jnp.dot(x_ref[...], w_ref[...], preferred_element_type=jnp.float32)
        y = y + b_ref[...]
        # NaN-safe select (also zeroes the bias on masked rows).
        y = jnp.where(mask_ref[...] != 0, y, 0.0)
        o_ref[...] = y.astype(o_ref.dtype)

    @pl.when(jnp.logical_not(valid))
    def _skip():
        # Whole row-tile is past emb_len: no MXU work; its activation DMA was
        # also elided because the x index_map clamps to the last valid tile.
        o_ref[...] = jnp.zeros_like(o_ref)


def _decoder_kernel_3d(tile_valid_ref, fetch_ref, x_ref, w_ref, b_ref, mask_ref,
                       o_ref, acc_ref):
    del fetch_ref
    i = pl.program_id(0)
    k = pl.program_id(2)
    nk = pl.num_programs(2)
    valid = tile_valid_ref[i] != 0

    @pl.when(valid)
    def _compute():
        @pl.when(k == 0)
        def _init():
            acc_ref[...] = jnp.zeros_like(acc_ref)

        acc_ref[...] += jnp.dot(x_ref[...], w_ref[...],
                                preferred_element_type=jnp.float32)

        @pl.when(k == nk - 1)
        def _finish():
            y = acc_ref[...] + b_ref[...]
            y = jnp.where(mask_ref[...] != 0, y, 0.0)
            o_ref[...] = y.astype(o_ref.dtype)

    @pl.when(jnp.logical_not(valid))
    def _skip():
        @pl.when(k == nk - 1)
        def _zero():
            o_ref[...] = jnp.zeros_like(o_ref)


# ---------------------------------------------------------------------------
# Wrapper
# ---------------------------------------------------------------------------
def linear_decoder(emb, emb_len, weight, bias, *, tm=None, tn=None, tk=None,
                   compute_dtype=None):
    """emb: [B,T,Din]; emb_len: [B] int or None; weight: [Din,Dout]; bias: [Dout]."""
    B, T, Din = emb.shape
    Dout = weight.shape[1]
    out_dtype = emb.dtype
    M = B * T

    # No silent parameter downcast: default compute dtype is the promoted
    # emb/weight dtype.  Pass compute_dtype=jnp.bfloat16 explicitly to run the
    # MXU at full bf16 rate on v6e/v7x (accumulation stays f32 regardless).
    if compute_dtype is None:
        compute_dtype = jnp.result_type(emb.dtype, weight.dtype)
    in_isz = jnp.dtype(compute_dtype).itemsize
    out_isz = jnp.dtype(out_dtype).itemsize
    sub = {4: 8, 2: 16, 1: 32}.get(in_isz, 8)   # dtype-aware sublane rounding

    if emb_len is None:
        emb_len = jnp.full((B,), T, dtype=jnp.int32)
    emb_len = emb_len.astype(jnp.int32)

    # ---- lane-dense N; K padded only when cheap or required by K tiling -----
    n_pad = _round_up(Dout, 128)
    kdim = Din
    if Din % 128 and (_round_up(Din, 128) - Din) <= max(Din // 8, 8):
        kdim = _round_up(Din, 128)      # cheap relative overhead: align lanes

    budget = _vmem_budget_bytes()
    tm, tn, tk = _choose_tiles(M, kdim, n_pad, in_isz, out_isz, sub, budget,
                               tm, tn, tk)
    if tk < kdim:
        kdim = _round_up(kdim, tk)      # K tiling: no ragged (garbage) K block
    num_m = _cdiv(M, tm)
    num_n = _cdiv(n_pad, tn)
    num_k = _cdiv(kdim, tk)

    # ---- operands (activations copied only if K needs zero-padding) ---------
    x2d = emb.reshape(M, Din).astype(compute_dtype)
    if kdim > Din:
        x2d = jnp.pad(x2d, ((0, 0), (0, kdim - Din)))
    w_pad = jnp.pad(weight.astype(compute_dtype),
                    ((0, kdim - Din), (0, n_pad - Dout)))
    b_pad = jnp.pad(bias.astype(jnp.float32), (0, n_pad - Dout)).reshape(1, n_pad)

    # ---- per-row validity + per-row-tile skip metadata (scalar prefetch) ----
    valid_rows = (jnp.arange(T, dtype=jnp.int32)[None, :] < emb_len[:, None])
    valid_rows = valid_rows.reshape(M)
    mask2d = valid_rows.astype(jnp.int32).reshape(M, 1)
    valid_tiles = jnp.pad(valid_rows, (0, num_m * tm - M)).reshape(num_m, tm).any(axis=1)
    tile_valid = valid_tiles.astype(jnp.int32)
    # Clamp skipped tiles' x fetch to the last valid tile: consecutive identical
    # block indices are deduplicated, so fully-masked tiles skip their input DMA.
    idx = jnp.arange(num_m, dtype=jnp.int32)
    x_fetch = jnp.maximum(jax.lax.cummax(jnp.where(valid_tiles, idx, -1)), 0)
    x_fetch = x_fetch.astype(jnp.int32)

    # ---- grid / specs --------------------------------------------------------
    if num_k == 1:
        # Choose axis order to minimize replicated HBM traffic:
        #   M-outer: weight re-read num_m times (if num_n > 1), activations once.
        #   N-outer: weight read once, activations re-read num_n times.
        w_bytes = kdim * n_pad * in_isz
        x_bytes = M * kdim * in_isz
        n_outer = num_n > 1 and (num_m - 1) * w_bytes > (num_n - 1) * x_bytes
        if n_outer:
            grid = (num_n, num_m)
            in_specs = [
                pl.BlockSpec((tm, kdim), lambda j, i, tv, fx: (fx[i], 0)),
                pl.BlockSpec((kdim, tn), lambda j, i, tv, fx: (0, j)),
                pl.BlockSpec((1, tn), lambda j, i, tv, fx: (0, j)),
                pl.BlockSpec((tm, 1), lambda j, i, tv, fx: (i, 0)),
            ]
            out_specs = pl.BlockSpec((tm, tn), lambda j, i, tv, fx: (i, j))
            kernel = functools.partial(_decoder_kernel_2d, m_axis=1)
            weight_reads, act_reads = 1, num_n
        else:
            grid = (num_m, num_n)
            in_specs = [
                pl.BlockSpec((tm, kdim), lambda i, j, tv, fx: (fx[i], 0)),
                pl.BlockSpec((kdim, tn), lambda i, j, tv, fx: (0, j)),
                pl.BlockSpec((1, tn), lambda i, j, tv, fx: (0, j)),
                pl.BlockSpec((tm, 1), lambda i, j, tv, fx: (i, 0)),
            ]
            out_specs = pl.BlockSpec((tm, tn), lambda i, j, tv, fx: (i, j))
            kernel = functools.partial(_decoder_kernel_2d, m_axis=0)
            weight_reads = 1 if num_n == 1 else num_m
            act_reads = 1
        scratch_shapes = []
        dim_sem = ("parallel", "parallel")
    else:
        grid = (num_m, num_n, num_k)
        in_specs = [
            pl.BlockSpec((tm, tk), lambda i, j, k, tv, fx: (fx[i], k)),
            pl.BlockSpec((tk, tn), lambda i, j, k, tv, fx: (k, j)),
            pl.BlockSpec((1, tn), lambda i, j, k, tv, fx: (0, j)),
            pl.BlockSpec((tm, 1), lambda i, j, k, tv, fx: (i, 0)),
        ]
        out_specs = pl.BlockSpec((tm, tn), lambda i, j, k, tv, fx: (i, j))
        kernel = _decoder_kernel_3d
        scratch_shapes = [pltpu.VMEM((tm, tn), jnp.float32)]
        dim_sem = ("parallel", "parallel", "arbitrary")
        weight_reads, act_reads = num_m, num_n

    cost = pl.CostEstimate(
        flops=2 * M * Din * Dout,
        transcendentals=0,
        bytes_accessed=int(
            act_reads * M * kdim * in_isz
            + weight_reads * kdim * n_pad * in_isz
            + n_pad * 4 + M * 4
            + M * n_pad * out_isz
        ),
    )

    grid_spec = pltpu.PrefetchScalarGridSpec(
        num_scalar_prefetch=2,
        grid=grid,
        in_specs=in_specs,
        out_specs=out_specs,
        scratch_shapes=scratch_shapes,
    )

    out_pad = pl.pallas_call(
        kernel,
        out_shape=jax.ShapeDtypeStruct((M, n_pad), out_dtype),
        grid_spec=grid_spec,
        compiler_params=pltpu.CompilerParams(
            dimension_semantics=dim_sem,
            vmem_limit_bytes=budget,
        ),
        cost_estimate=cost,
    )(tile_valid, x_fetch, x2d, w_pad, b_pad, mask2d)

    if n_pad != Dout:
        out_pad = out_pad[:, :Dout]
    return out_pad.reshape(B, T, Dout)


# ---------------------------------------------------------------------------
# Reference + self-test
# ---------------------------------------------------------------------------
def _reference(emb, emb_len, weight, bias):
    B, T, _ = emb.shape
    ref = jnp.einsum("btd,do->bto", emb, weight,
                     precision=jax.lax.Precision.HIGHEST) + bias
    if emb_len is not None:
        mask = (jnp.arange(T)[None, :] < emb_len[:, None])[..., None]
        ref = jnp.where(mask, ref, 0.0)
    return ref


if __name__ == "__main__":
    key = jax.random.PRNGKey(0)
    k_emb, k_w, k_b, k_emb2 = jax.random.split(key, 4)

    # ---- Case 1: small shapes consistent with the module (single-tile grid) --
    B, T, IN_DIM, OUT_DIM = 2, 8, 32, 16
    emb = jax.random.normal(k_emb, (B, T, IN_DIM), dtype=jnp.float32)
    emb_len = jnp.array([T, T - 3], dtype=jnp.int32)
    weight = jax.random.normal(k_w, (IN_DIM, OUT_DIM), dtype=jnp.float32) * 0.02
    bias = jax.random.normal(k_b, (OUT_DIM,), dtype=jnp.float32) * 0.02

    out = jax.block_until_ready(linear_decoder(emb, emb_len, weight, bias))
    ref = _reference(emb, emb_len, weight, bias)
    assert out.shape == (B, T, OUT_DIM)
    assert jnp.allclose(out, ref, atol=1e-3, rtol=1e-3), "mismatch vs reference (case 1)"

    # ---- Case 2: multi-tile grid, exercises the masked-tile skip + DMA dedup -
    B2, T2, IN2, OUT2 = 2, 64, 32, 24
    emb2 = jax.random.normal(k_emb2, (B2, T2, IN2), dtype=jnp.float32)
    emb_len2 = jnp.array([10, T2], dtype=jnp.int32)   # batch 0 mostly padding
    weight2 = jax.random.normal(k_w, (IN2, OUT2), dtype=jnp.float32) * 0.02
    bias2 = jax.random.normal(k_b, (OUT2,), dtype=jnp.float32) * 0.02

    out2 = jax.block_until_ready(
        linear_decoder(emb2, emb_len2, weight2, bias2, tm=32))
    ref2 = _reference(emb2, emb_len2, weight2, bias2)
    assert out2.shape == (B2, T2, OUT2)
    assert jnp.allclose(out2, ref2, atol=1e-3, rtol=1e-3), "mismatch vs reference (case 2)"

    # ---- Case 3: emb_len=None (all timesteps valid) ---------------------------
    out3 = jax.block_until_ready(linear_decoder(emb, None, weight, bias))
    ref3 = _reference(emb, None, weight, bias)
    assert jnp.allclose(out3, ref3, atol=1e-3, rtol=1e-3), "mismatch vs reference (case 3)"

    print("KERNEL_OK")
</pallas_src>

<mosaic_0001>
module attributes {stable_mosaic.version = 11 : i64} {
  func.func @_decoder_kernel_2d(%arg0: i32, %arg1: i32, %arg2: memref<1xi32, #tpu.memory_space<smem>>, %arg3: memref<1xi32, #tpu.memory_space<smem>>, %arg4: memref<16x32xf32, #tpu.memory_space<vmem>>, %arg5: memref<32x128xf32, #tpu.memory_space<vmem>>, %arg6: memref<1x128xf32, #tpu.memory_space<vmem>>, %arg7: memref<16x1xi32, #tpu.memory_space<vmem>>, %arg8: memref<16x128xf32, #tpu.memory_space<vmem>>) attributes {dimension_semantics = [#tpu.dimension_semantics<parallel>, #tpu.dimension_semantics<parallel>], iteration_bounds = array<i64: 1, 1>, scalar_prefetch = 2 : i64, scratch_operands = 0 : i64, tpu.core_type = #tpu.core_type<tc>, window_params = [{transform_indices = @transform_0, window_bounds = array<i64: 16, 32>}, {transform_indices = @transform_1, window_bounds = array<i64: 32, 128>}, {transform_indices = @transform_2, window_bounds = array<i64: 1, 128>}, {transform_indices = @transform_3, window_bounds = array<i64: 16, 1>}, {transform_indices = @transform_4, window_bounds = array<i64: 16, 128>}]} {
    %0 = arith.index_cast %arg0 : i32 to index
    %1 = memref.load %arg2[%0] : memref<1xi32, #tpu.memory_space<smem>>
    %c0_i32 = arith.constant 0 : i32
    %2 = arith.cmpi ne, %1, %c0_i32 : i32
    %3 = arith.extui %2 : i1 to i32
    %c0_i32_0 = arith.constant 0 : i32
    %4 = arith.cmpi ne, %3, %c0_i32_0 : i32
    scf.if %4 {
      %c0 = arith.constant 0 : index
      %c0_2 = arith.constant 0 : index
      %8 = vector.load %arg4[%c0, %c0_2] : memref<16x32xf32, #tpu.memory_space<vmem>>, vector<16x32xf32>
      %c0_3 = arith.constant 0 : index
      %c0_4 = arith.constant 0 : index
      %9 = vector.load %arg5[%c0_3, %c0_4] : memref<32x128xf32, #tpu.memory_space<vmem>>, vector<32x128xf32>
      %cst = arith.constant dense<0.000000e+00> : vector<16x128xf32>
      %10 = tpu.matmul %8, %9, %cst {dimension_numbers = #tpu.dot_dimension_numbers<[1], [0], [0], [1], [0, 0, 1, 1], [], []>} : vector<16x32xf32>, vector<32x128xf32>, vector<16x128xf32> -> vector<16x128xf32>
      %c0_5 = arith.constant 0 : index
      %c0_6 = arith.constant 0 : index
      %11 = vector.load %arg6[%c0_5, %c0_6] : memref<1x128xf32, #tpu.memory_space<vmem>>, vector<1x128xf32>
      %12 = vector.broadcast %11 : vector<1x128xf32> to vector<16x128xf32>
      %13 = arith.addf %10, %12 : vector<16x128xf32>
      %c0_7 = arith.constant 0 : index
      %c0_8 = arith.constant 0 : index
      %14 = vector.load %arg7[%c0_7, %c0_8] : memref<16x1xi32, #tpu.memory_space<vmem>>, vector<16x1xi32>
      %c0_i32_9 = arith.constant 0 : i32
      %15 = vector.broadcast %c0_i32_9 : i32 to vector<16x1xi32>
      %16 = arith.cmpi ne, %14, %15 : vector<16x1xi32>
      %cst_10 = arith.constant 0.000000e+00 : f32
      %17 = vector.shape_cast %16 : vector<16x1xi1> to vector<16x1xi1>
      %18 = vector.broadcast %17 : vector<16x1xi1> to vector<16x128xi1>
      %19 = vector.broadcast %cst_10 : f32 to vector<16x128xf32>
      %20 = arith.select %18, %13, %19 : vector<16x128xi1>, vector<16x128xf32>
      %c0_11 = arith.constant 0 : index
      %c0_12 = arith.constant 0 : index
      %21 = vector.load %arg8[%c0_11, %c0_12] : memref<16x128xf32, #tpu.memory_space<vmem>>, vector<16x128xf32>
      tpu.vector_store %arg8[%c0_11, %c0_12], %20 {strides = array<i32>} : memref<16x128xf32, #tpu.memory_space<vmem>>, vector<16x128xf32>,
    } else {
    }
    %true = arith.constant true
    %5 = arith.xori %2, %true : i1
    %6 = arith.extui %5 : i1 to i32
    %c0_i32_1 = arith.constant 0 : i32
    %7 = arith.cmpi ne, %6, %c0_i32_1 : i32
    scf.if %7 {
      %cst = arith.constant 0.000000e+00 : f32
      %8 = vector.broadcast %cst : f32 to vector<16x128xf32>
      %c0 = arith.constant 0 : index
      %c0_2 = arith.constant 0 : index
      %9 = vector.load %arg8[%c0, %c0_2] : memref<16x128xf32, #tpu.memory_space<vmem>>, vector<16x128xf32>
      tpu.vector_store %arg8[%c0, %c0_2], %8 {strides = array<i32>} : memref<16x128xf32, #tpu.memory_space<vmem>>, vector<16x128xf32>,
    } else {
    }
    return
  }
  func.func @transform_0(%arg0: i32, %arg1: i32, %arg2: memref<1xi32, #tpu.memory_space<smem>>, %arg3: memref<1xi32, #tpu.memory_space<smem>>) -> (i32, i32) {
    %0 = arith.index_cast %arg0 : i32 to index
    %1 = memref.load %arg3[%0] : memref<1xi32, #tpu.memory_space<smem>>
    %c0_i32 = arith.constant 0 : i32
    %c0_i32_0 = arith.constant 0 : i32
    return %1, %c0_i32 : i32, i32
  }
  func.func @transform_1(%arg0: i32, %arg1: i32, %arg2: memref<1xi32, #tpu.memory_space<smem>>, %arg3: memref<1xi32, #tpu.memory_space<smem>>) -> (i32, i32) {
    %c0_i32 = arith.constant 0 : i32
    %c0_i32_0 = arith.constant 0 : i32
    return %c0_i32, %arg1 : i32, i32
  }
  func.func @transform_2(%arg0: i32, %arg1: i32, %arg2: memref<1xi32, #tpu.memory_space<smem>>, %arg3: memref<1xi32, #tpu.memory_space<smem>>) -> (i32, i32) {
    %c0_i32 = arith.constant 0 : i32
    %c0_i32_0 = arith.constant 0 : i32
    return %c0_i32, %arg1 : i32, i32
  }
  func.func @transform_3(%arg0: i32, %arg1: i32, %arg2: memref<1xi32, #tpu.memory_space<smem>>, %arg3: memref<1xi32, #tpu.memory_space<smem>>) -> (i32, i32) {
    %c0_i32 = arith.constant 0 : i32
    %c0_i32_0 = arith.constant 0 : i32
    return %arg0, %c0_i32 : i32, i32
  }
  func.func @transform_4(%arg0: i32, %arg1: i32, %arg2: memref<1xi32, #tpu.memory_space<smem>>, %arg3: memref<1xi32, #tpu.memory_space<smem>>) -> (i32, i32) {
    %c0_i32 = arith.constant 0 : i32
    return %arg0, %arg1 : i32, i32
  }
}

</mosaic_0001>

<bundles_post_ra>
// kernel: tpu_custom_call.1
= control target key start
LH: loop header
LB: loop body
LE: loop exit
PB: predicated region body
PF: predicated region fallthrough
CT: control target
= control target key end

     0   :  { %13 = vsyncpa [#allocation6], 0  ;;  %s386_s0 = inlined_call_operand.<no memory space> [shape: s32[1], index: 0, kind: input, shape index: {}]   ;;  %s387_s1 = inlined_call_operand.<no memory space> [shape: s32[1], index: 1, kind: input, shape index: {}]   ;;  %s388_s2 = inlined_call_operand.vmem [shape: f32[16,32], index: 2, kind: input, shape index: {}]   ;;  %s389_s3 = inlined_call_operand.hbm [shape: f32[32,128], index: 3, kind: input, shape index: {}]   ;;  %s390_s4 = inlined_call_operand.vmem [shape: f32[1,128], index: 4, kind: input, shape index: {}]   ;;  %s391_s5 = inlined_call_operand.vmem [shape: s32[16,1], index: 5, kind: input, shape index: {}]   ;;  %s392_s6 = inlined_call_operand.hbm [shape: f32[16,128], index: 6, kind: output, shape index: {}]  }
   0x1   :  { %14 = vsyncpa [#allocation7], 0  ;;  %s292_s21 = smov [#allocation5]   ;;  %s244_s25 = scalar_lea.hbm %s389_s3, 512 }
   0x2   :  { %s30_s22 = sshll.u32 %s292_s21, 4  ;;  %p245_p0 = scmp.ne.s32.totalorder %s389_s3, %s244_s25  ;;  %s31_s22 = int_to_ptr.vmem [resolvable:$true] %s30_s22 }
   0x3   :  { %p248_p1 = scmp.lt.u32.totalorder %s244_s25, %s389_s3 }
   0x5   :  { %p250_p2 = pnand %p248_p1, %p245_p0 }
   0x7   :  { %253 = shalt.err (!%p250_p2)
}
   0x8   :  { %s254_s30 = scalar_lea.vmem %s31_s22, 512  ;;  %p259_p4 = scmp.lt.s32.totalorder %s31_s22, %s31_s22 }
   0x9   :  { %p255_p3 = scmp.ne.s32.totalorder %s31_s22, %s254_s30  ;;  %p260_p5 = scmp.lt.s32.totalorder %s254_s30, %s254_s30 }
   0xb   :  { %p261_p6 = por %p260_p5, %p259_p4 }
   0xd   :  { %p262_p7 = pnand %p261_p6, %p255_p3 }
   0xf   :  { %265 = shalt.err (!%p262_p7)
}
  0x10   :  { %s293_s7 = smov 128   ;;  %s294_s8 = smov 8  }
  0x11   :  { %36 = dma.hbm_to_vmem [thread:$0]  %s389_s3, 512, %s31_s22, [#allocation6], %s293_s7, %s293_s7, %s294_s8  }
  0x12   :  { %288 = dma.done.wait [#allocation6], 512  }
  0x13   :  { %289 = vsyncadd [#allocation6], 4294966784  ;;  %s205_s13 = sshll.u32 %s387_s1, 1  ;;  %p207_p9 = scmp.eq.s32.totalorder %s386_s0, 0 }
  0x14   :  { %p52_p8 = scmp.lt.s32.totalorder %s205_s13, 1  ;;  %v65_v0 = vld [vmem:[#allocation5] sm:$0xff] (!%p207_p9)  ;;  %v66_v1 = vld [vmem:[#allocation5 + $0x8] sm:$0xff] (!%p207_p9)  ;;  %v67_v2 = vld [vmem:[#allocation5 + $0x10] sm:$0xff] (!%p207_p9)  ;;  %vm76_vm0 = vcmask (!%p207_p9), 261120   ;;  %v295_v6 = vmov (!%p207_p9), 0  }
  0x15   :  { %62 = sbr.rel (%p207_p9) target bundleno = 248 (0xf8), region = 25  ;;  %v229_v3 = vpack.c.bf16 (!%p207_p9), %v66_v1, %v65_v0  ;;  %v68_v4 = vld [vmem:[#allocation5 + $0x18] sm:$0xff] (!%p207_p9)  ;;  %243 = vset.pattern.permute.xlu0 (!%p207_p9), %v295_v6  ;;  %v158_v8 = vld [vmem:[%s391_s5] sm:$0xff] (!%p207_p9)  ;;  %v159_v9 = vld [vmem:[%s391_s5 + $0x8] sm:$0xff] (!%p207_p9) }
  0x16   :  { %s394_s13 = smov (!%p52_p8, %s205_s13), 1  ;;  %v233_v7 = vpack.c.bf16 (!%p207_p9), %v68_v4, %v67_v2  ;;  %vm160_vm1 = vcmp.ne.s32.totalorder (!%p207_p9), %v158_v8, 0  ;;  %vm161_vm2 = vcmp.ne.s32.totalorder (!%p207_p9), %v159_v9, 0  ;;  %v208_v14 = vld [vmem:[%s390_s4] ss:$0 sm:$0xff] (!%p207_p9) }
  0x17   :  { %s206_s14 = sshll.u32 %s394_s13, 3  ;;  %230 = vmatprep.subr.bf16.mxu0 (!%p207_p9), %v229_v3  ;;  %v162_v10 = vsel (!%p207_p9), %vm160_vm1, 1, %v295_v6  ;;  %v163_v11 = vsel (!%p207_p9), %vm161_vm2, 1, %v295_v6 }
  0x18   :  { %s55_s17 = scalar_lea.vmem %s388_s2, %s206_s14  ;;  %232 = vmatpush3.bf16.msra.mxu0 (!%p207_p9), %v229_v3  ;;  %165 = vperm.xlu0 (!%p207_p9), %243, %v162_v10  }
  0x19   :  { %v63_v5 = vld [vmem:[%s55_s17] sm:$0xff] (!%p207_p9)  ;;  %234 = vmatprep.subr.bf16.mxu0 (!%p207_p9), %v233_v7  ;;  %v64_v12 = vld [vmem:[%s55_s17 + $0x8] sm:$0xff] (!%p207_p9) }
  0x1a   :  { %226 = vmatprep.mubr.msk.f32.mxu0 (!%p207_p9), %vm76_vm0, %v63_v5 }
  0x1c   :  { %236 = vmatpush3.bf16.msra.mxu0 %v233_v7  ;;  %168 = vperm.xlu0 %243, %v163_v11  }
  0x1f   :  { %227 = vmatmul.mubr.msk.f32.vlgmr.msra.gmra.mrb[0].mxu0 %vm76_vm0, %v64_v12 }
  0x97   :  { %v166_v13 = vpop.permute.xlu0 %165 }
  0x98   :  { %vm170_vm4 = vcmp.eq.s32.totalorder %v166_v13, 1 }
  0x9b   :  { %v169_v15 = vpop.permute.xlu0 %168 }
  0x9c   :  { %vm171_vm3 = vcmp.eq.s32.totalorder %v169_v15, 1 }
  0xf2   :  { %v228_v16 = vpop.f32.mrb[0].mxu0 }
  0xf3   :  { %v155_v17 = vadd.f32 %v228_v16, %v208_v14  ;;  %v149_v18 = vpop.f32.mrb[1].mxu0 }
  0xf4   :  { %v150_v19 = vadd.f32 %v208_v14, %v149_v18 }
  0xf5   :  { %v173_v20 = vsel %vm171_vm3, %v155_v17, 0.0 }
  0xf6   :  { %175 = vst [vmem:[#allocation8 + $0x8] sm:$0xff] %v173_v20  ;;  %v172_v21 = vsel %vm170_vm4, %v150_v19, 0.0 }
  0xf7   :  { %174 = vst [vmem:[#allocation8] sm:$0xff] %v172_v21 }
  0xf8 PF:  { %p211_p10 = scmp.ne.s32.totalorder %s386_s0, 0 }
  0xf9   :  { %v296_v22 = vmov (!%p211_p10), 0.0  }
  0xfa   :  { %179 = sbr.rel (%p211_p10) target bundleno = 257 (0x101), region = 29  ;;  %180 = vst [vmem:[#allocation8] sm:$0xff] (!%p211_p10), %v296_v22  ;;  %181 = vst [vmem:[#allocation8 + $0x8] sm:$0xff] (!%p211_p10), %v296_v22 }
 0x101 PF:  { %s297_s4 = smov [#allocation8]  }
 0x102   :  { %s187_s24 = sshll.u32 %s297_s4, 4  ;;  %s188_s24 = int_to_ptr.vmem [resolvable:$true] %s187_s24 }
 0x103   :  { %s266_s25 = scalar_lea.vmem %s188_s24, 256  ;;  %p271_p12 = scmp.lt.s32.totalorder %s188_s24, %s188_s24 }
 0x104   :  { %p267_p11 = scmp.ne.s32.totalorder %s188_s24, %s266_s25  ;;  %p272_p13 = scmp.lt.s32.totalorder %s266_s25, %s266_s25 }
 0x106   :  { %p273_p0 = por %p272_p13, %p271_p12 }
 0x108   :  { %p274_p1 = pnand %p273_p0, %p267_p11 }
 0x10a   :  { %277 = shalt.err (!%p274_p1)
}
 0x10b   :  { %s278_s28 = scalar_lea.hbm %s392_s6, 256 }
 0x10c   :  { %p279_p2 = scmp.ne.s32.totalorder %s392_s6, %s278_s28  ;;  %p282_p3 = scmp.lt.u32.totalorder %s278_s28, %s392_s6 }
 0x10e   :  { %p284_p4 = pnand %p282_p3, %p279_p2 }
 0x110   :  { %287 = shalt.err (!%p284_p4)
}
 0x111   :  { %193 = dma.vmem_to_hbm [thread:$0]  %s188_s24, 256, %s392_s6, [#allocation7], %s293_s7, %s293_s7, %s294_s8  }
 0x112   :  { %290 = dma.done.wait [#allocation7], 256  }
 0x113   :  { %291 = vsyncadd [#allocation7], 4294967040 }
 0x114   :  { %197 = vsyncpa [#allocation6], 1 }
 0x115   :  { %198 = vsyncpa [#allocation7], 1 }

</bundles_post_ra>
